<compile_context>
chip_gen: v6e
topology: v6e:2x2x1
jax: 0.10.0
libtpu: 0.0.40
codegen_flags: <defaults>
</compile_context>

<pallas_src>
import math
import jax
import jax.numpy as jnp
from jax.experimental import pallas as pl
from jax.experimental.pallas import tpu as pltpu

IN_C = 3
OUT_C = 6
KH, KW = 3, 3
LANE = 128  # pad the flattened pixel axis to a multiple of this


def conv2d_kernel(p_ref, w_ref, b_ref, o_ref):
    # p_ref: (K, Lp)   K = C*KH*KW = 27, Lp = ceil(N*OH*OW / 128) * 128
    # w_ref: (OC, K)
    # b_ref: (OC, 1)
    # o_ref: (OC, Lp)
    acc = jnp.dot(w_ref[...], p_ref[...],
                  preferred_element_type=jnp.float32) + b_ref[...]
    o_ref[...] = acc.astype(o_ref.dtype)      # full-width, unmasked vst (Lp % 128 == 0)


def _im2col_lanes(x, oh, ow):
    """x: (N, C, H, W) -> (C*KH*KW, N*OH*OW).

    Row order is c-major then (kh*KW + kw), matching weight.reshape(OC, C*KH*KW).
    Lane order is (n, oh, ow) flattened.
    """
    n, c, _, _ = x.shape
    cols = []
    for kh in range(KH):
        for kw in range(KW):
            cols.append(x[:, :, kh:kh + oh, kw:kw + ow])   # (N, C, OH, OW)
    taps = jnp.stack(cols, axis=2)                          # (N, C, KH*KW, OH, OW)
    taps = jnp.transpose(taps, (1, 2, 0, 3, 4))             # (C, KH*KW, N, OH, OW)
    return taps.reshape(c * KH * KW, n * oh * ow)


def my_conv2d(x, weight, bias):
    """x: (N, C, H, W) -> (N, OC, H-2, W-2), stride 1, no padding."""
    N, C, H, W = x.shape
    OC = weight.shape[0]
    OH, OW = H - KH + 1, W - KW + 1
    K = C * KH * KW
    L = N * OH * OW
    Lp = ((L + LANE - 1) // LANE) * LANE      # lane-dense, 128-multiple width

    patches = _im2col_lanes(x, OH, OW)        # (K, L)
    if Lp != L:
        patches = jnp.pad(patches, ((0, 0), (0, Lp - L)))
    w2d = weight.reshape(OC, K)               # (OC, K)
    b2d = bias.reshape(OC, 1)

    out_padded = pl.pallas_call(
        conv2d_kernel,
        out_shape=jax.ShapeDtypeStruct((OC, Lp), x.dtype),
        grid=(1,),                            # single step: problem is overhead-bound
        in_specs=[
            pl.BlockSpec((K, Lp), lambda i: (0, 0)),
            pl.BlockSpec((OC, K), lambda i: (0, 0)),
            pl.BlockSpec((OC, 1), lambda i: (0, 0)),
        ],
        out_specs=pl.BlockSpec((OC, Lp), lambda i: (0, 0)),
        compiler_params=pltpu.CompilerParams(
            dimension_semantics=("arbitrary",)),
    )(patches, w2d, b2d)

    out = out_padded[:, :L]                   # drop lane padding
    out = out.reshape(OC, N, OH, OW)
    return jnp.transpose(out, (1, 0, 2, 3))   # (N, OC, OH, OW)


if __name__ == "__main__":
    key = jax.random.PRNGKey(0)
    kx, kw, kb = jax.random.split(key, 3)

    # Deterministic parameter init mimicking PyTorch Conv2d default
    # (uniform(-1/sqrt(fan_in), 1/sqrt(fan_in)), fan_in = C*KH*KW = 27).
    fan_in = IN_C * KH * KW
    bound = 1.0 / math.sqrt(fan_in)
    weight = jax.random.uniform(kw, (OUT_C, IN_C, KH, KW),
                                minval=-bound, maxval=bound, dtype=jnp.float32)
    bias = jax.random.uniform(kb, (OUT_C,),
                              minval=-bound, maxval=bound, dtype=jnp.float32)

    # Small NCHW input consistent with the module (in_channels must be 3).
    x = jax.random.normal(kx, (2, IN_C, 16, 16), dtype=jnp.float32)

    out = my_conv2d(x, weight, bias)
    out = jax.block_until_ready(out)

    # Correctness check against XLA's reference conv (NCHW / OIHW).
    ref = jax.lax.conv_general_dilated(
        x, weight, window_strides=(1, 1), padding="VALID",
        dimension_numbers=("NCHW", "OIHW", "NCHW"),
    ) + bias.reshape(1, OUT_C, 1, 1)
    assert out.shape == (2, OUT_C, 14, 14)
    assert jnp.allclose(out, ref, atol=1e-5, rtol=1e-5)

    print("KERNEL_OK")
</pallas_src>

<mosaic_0001>
module attributes {stable_mosaic.version = 11 : i64} {
  func.func @conv2d_kernel(%arg0: i32, %arg1: memref<27x512xf32, #tpu.memory_space<vmem>>, %arg2: memref<6x27xf32, #tpu.memory_space<vmem>>, %arg3: memref<6x1xf32, #tpu.memory_space<vmem>>, %arg4: memref<6x512xf32, #tpu.memory_space<vmem>>) attributes {dimension_semantics = [#tpu.dimension_semantics<arbitrary>], iteration_bounds = array<i64: 1>, scalar_prefetch = 0 : i64, scratch_operands = 0 : i64, tpu.core_type = #tpu.core_type<tc>, window_params = [{pipeline_mode = #tpu.pipeline_mode<synchronous>, transform_indices = @transform_0, window_bounds = array<i64: 27, 512>}, {pipeline_mode = #tpu.pipeline_mode<synchronous>, transform_indices = @transform_1, window_bounds = array<i64: 6, 27>}, {pipeline_mode = #tpu.pipeline_mode<synchronous>, transform_indices = @transform_2, window_bounds = array<i64: 6, 1>}, {pipeline_mode = #tpu.pipeline_mode<synchronous>, transform_indices = @transform_3, window_bounds = array<i64: 6, 512>}]} {
    %c0 = arith.constant 0 : index
    %c0_0 = arith.constant 0 : index
    %0 = vector.load %arg2[%c0, %c0_0] : memref<6x27xf32, #tpu.memory_space<vmem>>, vector<6x27xf32>
    %c0_1 = arith.constant 0 : index
    %c0_2 = arith.constant 0 : index
    %1 = vector.load %arg1[%c0_1, %c0_2] : memref<27x512xf32, #tpu.memory_space<vmem>>, vector<27x512xf32>
    %cst = arith.constant dense<0.000000e+00> : vector<6x512xf32>
    %2 = tpu.matmul %0, %1, %cst {dimension_numbers = #tpu.dot_dimension_numbers<[1], [0], [0], [1], [0, 0, 1, 1], [], []>} : vector<6x27xf32>, vector<27x512xf32>, vector<6x512xf32> -> vector<6x512xf32>
    %c0_3 = arith.constant 0 : index
    %c0_4 = arith.constant 0 : index
    %3 = vector.load %arg3[%c0_3, %c0_4] : memref<6x1xf32, #tpu.memory_space<vmem>>, vector<6x1xf32>
    %4 = vector.broadcast %3 : vector<6x1xf32> to vector<6x512xf32>
    %5 = arith.addf %2, %4 : vector<6x512xf32>
    %c0_5 = arith.constant 0 : index
    %c0_6 = arith.constant 0 : index
    %6 = vector.load %arg4[%c0_5, %c0_6] : memref<6x512xf32, #tpu.memory_space<vmem>>, vector<6x512xf32>
    tpu.vector_store %arg4[%c0_5, %c0_6], %5 {strides = array<i32>} : memref<6x512xf32, #tpu.memory_space<vmem>>, vector<6x512xf32>,
    return
  }
  func.func @transform_0(%arg0: i32) -> (i32, i32) {
    %c0_i32 = arith.constant 0 : i32
    %c0_i32_0 = arith.constant 0 : i32
    %c0_i32_1 = arith.constant 0 : i32
    return %c0_i32, %c0_i32_0 : i32, i32
  }
  func.func @transform_1(%arg0: i32) -> (i32, i32) {
    %c0_i32 = arith.constant 0 : i32
    %c0_i32_0 = arith.constant 0 : i32
    %c0_i32_1 = arith.constant 0 : i32
    return %c0_i32, %c0_i32_0 : i32, i32
  }
  func.func @transform_2(%arg0: i32) -> (i32, i32) {
    %c0_i32 = arith.constant 0 : i32
    %c0_i32_0 = arith.constant 0 : i32
    %c0_i32_1 = arith.constant 0 : i32
    return %c0_i32, %c0_i32_0 : i32, i32
  }
  func.func @transform_3(%arg0: i32) -> (i32, i32) {
    %c0_i32 = arith.constant 0 : i32
    %c0_i32_0 = arith.constant 0 : i32
    %c0_i32_1 = arith.constant 0 : i32
    return %c0_i32, %c0_i32_0 : i32, i32
  }
}

</mosaic_0001>

<bundles_post_ra>
// kernel: tpu_custom_call.1
= control target key start
LH: loop header
LB: loop body
LE: loop exit
PB: predicated region body
PF: predicated region fallthrough
CT: control target
= control target key end

     0   :  { %8 = vsyncpa [#allocation3], 0  ;;  %s325_s0 = inlined_call_operand.hbm [shape: f32[27,512], index: 0, kind: input, shape index: {}]   ;;  %s326_s1 = inlined_call_operand.vmem [shape: f32[6,27], index: 1, kind: input, shape index: {}]   ;;  %s327_s2 = inlined_call_operand.vmem [shape: f32[6,1], index: 2, kind: input, shape index: {}]   ;;  %s328_s3 = inlined_call_operand.hbm [shape: f32[6,512], index: 3, kind: output, shape index: {}]  }
   0x1   :  { %9 = vsyncpa [#allocation4], 0  ;;  %s287_s12 = smov [#allocation2]  }
   0x2   :  { %s15_s13 = sshll.u32 %s287_s12, 4  ;;  %s16_s13 = int_to_ptr.vmem [resolvable:$true] %s15_s13 }
   0x3   :  { %s251_s14 = scalar_lea.vmem %s16_s13, 2048  ;;  %p256_p1 = scmp.lt.s32.totalorder %s16_s13, %s16_s13 }
   0x4   :  { %p252_p0 = scmp.ne.s32.totalorder %s16_s13, %s251_s14  ;;  %p257_p2 = scmp.lt.s32.totalorder %s251_s14, %s251_s14 }
   0x6   :  { %p258_p3 = por %p257_p2, %p256_p1 }
   0x8   :  { %p259_p4 = pnand %p258_p3, %p252_p0 }
   0xa   :  { %262 = shalt.err (!%p259_p4)
}
   0xb   :  { %s288_s15 = smov 512   ;;  %s289_s16 = smov 32  }
   0xc   :  { %21 = dma.hbm_to_vmem [thread:$0]  %s325_s0, 2048, %s16_s13, [#allocation3], %s288_s15, %s288_s15, %s289_s16  }
   0xd   :  { %283 = dma.done.wait [#allocation3], 2048  }
   0xe   :  { %284 = vsyncadd [#allocation3], 4294965248  ;;  %v290_v0 = vmov 0.0   ;;  %v291_v1 = vmov 0   ;;  %vm56_vm0 = vcmask 1042432   ;;  %v39_v6 = vld [vmem:[#allocation2 + $0x48] sm:$0xff] }
   0xf   :  { %133 = vmatprep.mubr.f32.mxu0 %v290_v0  ;;  %204 = vmatprep.mubr.f32.mxu1 %v290_v0  ;;  %v43_v2 = vld [vmem:[#allocation2 + $0x68] sm:$0x7]  ;;  %v45_v3 = vld [vmem:[#allocation2 + $0x78] sm:$0x7]  ;;  %v42_v4 = vld [vmem:[#allocation2 + $0x60] sm:$0x7] }
  0x10   :  { %242 = vset.pattern.permute.xlu0 %v291_v1  ;;  %230 = vmatprep.subr.msk.mxu0 %vm56_vm0, %v43_v2  ;;  %v44_v5 = vld [vmem:[#allocation2 + $0x70] sm:$0x7]  ;;  %v41_v7 = vld [vmem:[#allocation2 + $0x58] sm:$0xff]  ;;  %v38_v8 = vld [vmem:[#allocation2 + $0x40] sm:$0xff]  ;;  %vm52_vm1 = vcmask 220160   ;;  %s292_s22 = smov [#allocation5]  }
  0x11   :  { %233 = vmatprep.subr.msk.mxu1 %vm56_vm0, %v45_v3  ;;  %231 = vmatpush1.msk.msra.mxu0 %vm56_vm0, %v42_v4  ;;  %v40_v9 = vld [vmem:[#allocation2 + $0x50] sm:$0xff]  ;;  %v35_v10 = vld [vmem:[#allocation2 + $0x28] sm:$0xff]  ;;  %v37_v11 = vld [vmem:[#allocation2 + $0x38] sm:$0xff]  ;;  %s221_s23 = sshll.u32 %s292_s22, 4  ;;  %s222_s23 = int_to_ptr.vmem [resolvable:$true] %s221_s23 }
  0x12   :  { %234 = vmatpush1.msk.msra.mxu1 %vm56_vm0, %v44_v5  ;;  %95 = vmatprep.subr.mxu0 %v39_v6  ;;  %v34_v12 = vld [vmem:[#allocation2 + $0x20] sm:$0xff]  ;;  %v36_v13 = vld [vmem:[#allocation2 + $0x30] sm:$0xff]  ;;  %v31_v14 = vld [vmem:[#allocation2 + $0x8] sm:$0xff]  ;;  %p268_p6 = scmp.lt.s32.totalorder %s222_s23, %s222_s23 }
  0x13   :  { %166 = vmatprep.subr.mxu1 %v41_v7  ;;  %96 = vmatpush1.msra.mxu0 %v38_v8  ;;  %v33_v15 = vld [vmem:[#allocation2 + $0x18] sm:$0xff]  ;;  %v30_v16 = vld [vmem:[#allocation2] sm:$0xff]  ;;  %v32_v17 = vld [vmem:[#allocation2 + $0x10] sm:$0xff] }
  0x14   :  { %167 = vmatpush1.msra.mxu1 %v40_v9  ;;  %97 = vmatprep.subr.mxu0 %v35_v10  ;;  %v29_v18 = vld [vmem:[%s326_s1] sm:$0x3f]  ;;  %s263_s1 = scalar_lea.vmem %s222_s23, 512 }
  0x15   :  { %168 = vmatprep.subr.mxu1 %v37_v11  ;;  %98 = vmatpush1.msra.mxu0 %v34_v12  ;;  %v46_v19 = vld [vmem:[%s327_s2] sm:$0x3f]  ;;  %p264_p5 = scmp.ne.s32.totalorder %s222_s23, %s263_s1  ;;  %p269_p7 = scmp.lt.s32.totalorder %s263_s1, %s263_s1 }
  0x16   :  { %169 = vmatpush1.msra.mxu1 %v36_v13  ;;  %99 = vmatprep.subr.mxu0 %v31_v14 }
  0x17   :  { %170 = vmatprep.subr.mxu1 %v33_v15  ;;  %100 = vmatpush1.msra.mxu0 %v30_v16  ;;  %p270_p8 = por %p269_p7, %p268_p6 }
  0x18   :  { %171 = vmatpush1.msra.mxu1 %v32_v17  ;;  %232 = vmatmul.mubr.msk.f32.vlgmr.msra.gmra.mxu0 %vm52_vm1, %v29_v18 }
  0x19   :  { %235 = vmatmul.mubr.msk.f32.vlgmr.msra.gmra.mxu1 %vm52_vm1, %v29_v18  ;;  %49 = vperm.xlu0 %242, %v46_v19   ;;  %p271_p9 = pnand %p270_p8, %p264_p5 }
  0x94   :  { %v50_v20 = vpop.permute.xlu0 %49 }
  0xd8   :  { %v135_v21 = vpop.f32.mrf.mxu0 }
  0xd9   :  { %v206_v22 = vpop.f32.mrf.mxu1  ;;  %v136_v23 = vadd.f32 %v135_v21, %v50_v20 }
  0xda   :  { %v207_v24 = vadd.f32 %v206_v22, %v50_v20  ;;  %v137_v25 = vpop.f32.mrf.mxu0 }
  0xdb   :  { %v208_v26 = vpop.f32.mrf.mxu1  ;;  %211 = vst [vmem:[#allocation5] sm:$0x3f] %v136_v23  ;;  %v138_v27 = vadd.f32 %v137_v25, %v50_v20 }
  0xdc   :  { %213 = vst [vmem:[#allocation5 + $0x10] sm:$0x3f] %v207_v24  ;;  %v209_v28 = vadd.f32 %v208_v26, %v50_v20 }
  0xdd   :  { %212 = vst [vmem:[#allocation5 + $0x8] sm:$0x3f] %v138_v27 }
  0xde   :  { %214 = vst [vmem:[#allocation5 + $0x18] sm:$0x3f] %v209_v28 }
  0xdf   :  { %274 = shalt.err (!%p271_p9)
}
  0xe0   :  { %224 = dma.vmem_to_hbm [thread:$0]  %s222_s23, 512, %s328_s3, [#allocation4]  }
  0xe1   :  { %285 = dma.done.wait [#allocation4], 512  }
  0xe2   :  { %286 = vsyncadd [#allocation4], 4294966784 }
  0xe3   :  { %228 = vsyncpa [#allocation3], 1 }
  0xe4   :  { %229 = vsyncpa [#allocation4], 1 }

</bundles_post_ra>
